<compile_context>
chip_gen: v7x
topology: tpu7x:2x2x1
jax: 0.10.0
libtpu: 0.0.40
codegen_flags: <defaults>
</compile_context>

<pallas_src>
import functools

import jax
import jax.numpy as jnp
from jax import lax
from jax.experimental import pallas as pl
from jax.experimental.pallas import tpu as pltpu

LANE = 128


def _round_up(x, m):
    return ((x + m - 1) // m) * m


def mlp_critic_kernel(x_ref, w1_ref, b1_ref, w2_ref, b2_ref, w3_ref, b3_ref,
                      o_ref, *, matmul_dtype):
    # x_ref: [TB, obs_dim] -- natural HBM layout, no wrapper transpose.
    x = x_ref[...].astype(matmul_dtype)

    # Layer 1: contract obs_dim of w1 [H1, obs_dim] against obs_dim of x
    # [TB, obs_dim] -> [H1, TB].  The obs transpose is folded into the MXU
    # pass; batch ends up on lanes for everything downstream.
    h1 = lax.dot_general(
        w1_ref[...].astype(matmul_dtype), x,
        (((1,), (1,)), ((), ())),
        preferred_element_type=jnp.float32)
    h1 = jnp.tanh(h1 + b1_ref[...])                                  # [H1, TB]

    # Layer 2: [H2, H1] @ [H1, TB] -> [H2, TB].
    h2 = jnp.dot(w2_ref[...].astype(matmul_dtype), h1.astype(matmul_dtype),
                 preferred_element_type=jnp.float32)
    h2 = jnp.tanh(h2 + b2_ref[...])                                  # [H2, TB]
    # TODO(synk): for H1/H2 >= ~256 the single EUP slot (tanh) is the compute
    # ceiling; a VPU polynomial tanh would help there (noise at H=32).

    # Output layer (out_features = 1): VPU multiply + XLU sublane reduce
    # instead of an M=1 matmul; b3 is an SMEM scalar.
    v = jnp.sum(h2 * w3_ref[...], axis=0, keepdims=True) + b3_ref[0, 0]
    o_ref[...] = v                                       # [1, TB], lane-dense


def _pick_batch_tile(batch, obs_dim, h1_dim, h2_dim):
    """Pick the batch tile TB (rows of obs per grid step)."""
    if batch <= LANE:
        return batch                 # single full-array block, no padding

    # Target >= ~512 KiB of obs per DMA step (skinny obs needs a wide batch
    # tile to reach the HBM roofline), capped at 8192 rows.
    bytes_per_row = 4 * obs_dim
    tb = _round_up(max(1, (512 * 1024) // bytes_per_row), LANE)
    tb = max(LANE, min(tb, 8192))

    # Explicit VMEM budget (v7x: 64 MiB physical, 32 MiB default scoped):
    # double-buffered obs/out blocks + f32 h1/h2 intermediates + 2x weights.
    def resident_bytes(t):
        acts = 4 * t * (2 * obs_dim + h1_dim + h2_dim + 2)
        wts = 2 * 4 * (h1_dim * obs_dim + h1_dim +
                       h2_dim * h1_dim + h2_dim + h2_dim + 1)
        return acts + wts

    while tb > LANE and resident_bytes(tb) > 20 * 1024 * 1024:
        tb = max(LANE, (tb // 2) // LANE * LANE)

    # Never larger than the lane-rounded batch, and keep >= 2 grid steps so
    # dimension_semantics=("parallel",) can use both v7x TensorCores.
    tb = min(tb, _round_up(batch, LANE))
    if pl.cdiv(batch, tb) < 2:
        tb = max(LANE, _round_up(pl.cdiv(batch, 2), LANE))
    return tb


def mlp_critic_forward(obs, params, *, matmul_dtype=jnp.float32):
    """obs: [B, obs_dim] f32.
    params: (w1, b1, w2, b2, w3, b3) with
      w1: [H1, obs_dim], b1: [H1, 1], w2: [H2, H1], b2: [H2, 1],
      w3: [H2, 1],       b3: [1, 1].
    Returns [B]  (== torch.squeeze(v_net(obs), -1)).
    matmul_dtype=jnp.bfloat16 is an option for v6e/v7x (use ~1e-2 tolerance)."""
    w1, b1, w2, b2, w3, b3 = params
    batch, obs_dim = obs.shape
    h1_dim, h2_dim = w1.shape[0], w2.shape[0]

    tb = _pick_batch_tile(batch, obs_dim, h1_dim, h2_dim)
    steps = pl.cdiv(batch, tb)

    n_weight_elems = int(w1.size + b1.size + w2.size + b2.size + w3.size + b3.size)
    cost = pl.CostEstimate(
        flops=int(2 * batch * (h1_dim * obs_dim + h2_dim * h1_dim + h2_dim)),
        transcendentals=int(batch * (h1_dim + h2_dim)),
        bytes_accessed=int(4 * (batch * obs_dim + batch) + 4 * steps * n_weight_elems),
    )

    def const_spec(shape):
        # Grid-invariant block (weights / hidden biases): same block every step.
        # TODO(synk): pipeline_mode=pl.Buffered(1) would drop the unused second
        # VMEM buffer for these constant blocks; skipped for portability.
        return pl.BlockSpec(shape, lambda i: tuple(0 for _ in shape))

    out = pl.pallas_call(
        functools.partial(mlp_critic_kernel, matmul_dtype=matmul_dtype),
        out_shape=jax.ShapeDtypeStruct((1, batch), jnp.float32),
        grid=(steps,),
        in_specs=[
            pl.BlockSpec((tb, obs_dim), lambda i: (i, 0)),     # obs tile (natural layout)
            const_spec(w1.shape), const_spec(b1.shape),
            const_spec(w2.shape), const_spec(b2.shape),
            const_spec(w3.shape),
            pl.BlockSpec(memory_space=pltpu.MemorySpace.SMEM),  # b3 scalar in SMEM
        ],
        out_specs=pl.BlockSpec((1, tb), lambda i: (0, i)),
        compiler_params=pltpu.CompilerParams(
            dimension_semantics=("parallel",),   # shard batch steps across v7x TCs
        ),
        cost_estimate=cost,
    )(obs, w1, b1, w2, b2, w3, b3)

    # Squeeze the value dim (done outside the kernel).
    return out[0]


def init_params(key, obs_dim, hidden_sizes):
    """PyTorch-default-style init, stored in the kernel's layout:
    w: [out, in], b: [out, 1] (last layer w stored as [H_last, 1], b as [1, 1])."""
    sizes = [obs_dim] + list(hidden_sizes) + [1]
    params = []
    for j in range(len(sizes) - 1):
        key, kw, kb = jax.random.split(key, 3)
        fan_in, fan_out = sizes[j], sizes[j + 1]
        bound = 1.0 / jnp.sqrt(fan_in)
        w = jax.random.uniform(kw, (fan_out, fan_in), jnp.float32, -bound, bound)
        b = jax.random.uniform(kb, (fan_out, 1), jnp.float32, -bound, bound)
        if j == len(sizes) - 2:
            w = w.T          # [H_last, 1] column for the lane-broadcast reduce
            b = b.T          # [1, 1]
        params += [w, b]
    return tuple(params)


def reference_forward(obs, params):
    w1, b1, w2, b2, w3, b3 = params
    h1 = jnp.tanh(obs @ w1.T + b1.T)
    h2 = jnp.tanh(h1 @ w2.T + b2.T)
    return jnp.squeeze(h2 @ w3 + b3, axis=-1)


if __name__ == "__main__":
    key = jax.random.PRNGKey(0)
    obs_dim = 16
    hidden_sizes = (32, 32)

    key, k_small, k_big = jax.random.split(key, 3)
    params = init_params(key, obs_dim, hidden_sizes)

    # Small batch: single full-array block (B <= 128 path).
    obs_small = jax.random.normal(k_small, (8, obs_dim), dtype=jnp.float32)
    v_small = jax.block_until_ready(mlp_critic_forward(obs_small, params))
    v_small_ref = reference_forward(obs_small, params)
    assert v_small.shape == (8,), v_small.shape
    assert jnp.allclose(v_small, v_small_ref, atol=1e-5, rtol=1e-5), (v_small, v_small_ref)

    # Larger batch: >= 2 grid steps (both v7x TCs) with a ragged last block.
    obs_big = jax.random.normal(k_big, (200, obs_dim), dtype=jnp.float32)
    v_big = jax.block_until_ready(mlp_critic_forward(obs_big, params))
    v_big_ref = reference_forward(obs_big, params)
    assert v_big.shape == (200,), v_big.shape
    assert jnp.allclose(v_big, v_big_ref, atol=1e-5, rtol=1e-5), (v_big, v_big_ref)

    print("KERNEL_OK")
</pallas_src>

<mosaic_0001>
module attributes {stable_mosaic.version = 11 : i64} {
  func.func @mlp_critic_kernel(%arg0: i32, %arg1: memref<8x16xf32, #tpu.memory_space<vmem>>, %arg2: memref<32x16xf32, #tpu.memory_space<vmem>>, %arg3: memref<32x1xf32, #tpu.memory_space<vmem>>, %arg4: memref<32x32xf32, #tpu.memory_space<vmem>>, %arg5: memref<32x1xf32, #tpu.memory_space<vmem>>, %arg6: memref<32x1xf32, #tpu.memory_space<vmem>>, %arg7: memref<1x1xf32, #tpu.memory_space<smem>>, %arg8: memref<1x8xf32, #tpu.memory_space<vmem>>) attributes {dimension_semantics = [#tpu.dimension_semantics<parallel>], iteration_bounds = array<i64: 1>, scalar_prefetch = 0 : i64, scratch_operands = 0 : i64, tpu.core_type = #tpu.core_type<tc>, window_params = [{transform_indices = @transform_0, window_bounds = array<i64: 8, 16>}, {pipeline_mode = #tpu.pipeline_mode<synchronous>, transform_indices = @transform_1, window_bounds = array<i64: 32, 16>}, {pipeline_mode = #tpu.pipeline_mode<synchronous>, transform_indices = @transform_2, window_bounds = array<i64: 32, 1>}, {pipeline_mode = #tpu.pipeline_mode<synchronous>, transform_indices = @transform_3, window_bounds = array<i64: 32, 32>}, {pipeline_mode = #tpu.pipeline_mode<synchronous>, transform_indices = @transform_4, window_bounds = array<i64: 32, 1>}, {pipeline_mode = #tpu.pipeline_mode<synchronous>, transform_indices = @transform_5, window_bounds = array<i64: 32, 1>}, {transform_indices = @transform_6, window_bounds = array<i64: 1, 1>}, {transform_indices = @transform_7, window_bounds = array<i64: 1, 8>}]} {
    %c0 = arith.constant 0 : index
    %c0_0 = arith.constant 0 : index
    %0 = vector.load %arg1[%c0, %c0_0] : memref<8x16xf32, #tpu.memory_space<vmem>>, vector<8x16xf32>
    %c0_1 = arith.constant 0 : index
    %c0_2 = arith.constant 0 : index
    %1 = vector.load %arg2[%c0_1, %c0_2] : memref<32x16xf32, #tpu.memory_space<vmem>>, vector<32x16xf32>
    %cst = arith.constant dense<0.000000e+00> : vector<32x8xf32>
    %2 = tpu.matmul %1, %0, %cst {dimension_numbers = #tpu.dot_dimension_numbers<[1], [1], [0], [0], [0, 0, 1, 0], [], []>} : vector<32x16xf32>, vector<8x16xf32>, vector<32x8xf32> -> vector<32x8xf32>
    %c0_3 = arith.constant 0 : index
    %c0_4 = arith.constant 0 : index
    %3 = vector.load %arg3[%c0_3, %c0_4] : memref<32x1xf32, #tpu.memory_space<vmem>>, vector<32x1xf32>
    %4 = vector.broadcast %3 : vector<32x1xf32> to vector<32x8xf32>
    %5 = arith.addf %2, %4 : vector<32x8xf32>
    %6 = math.tanh %5 : vector<32x8xf32>
    %c0_5 = arith.constant 0 : index
    %c0_6 = arith.constant 0 : index
    %7 = vector.load %arg4[%c0_5, %c0_6] : memref<32x32xf32, #tpu.memory_space<vmem>>, vector<32x32xf32>
    %cst_7 = arith.constant dense<0.000000e+00> : vector<32x8xf32>
    %8 = tpu.matmul %7, %6, %cst_7 {dimension_numbers = #tpu.dot_dimension_numbers<[1], [0], [0], [1], [0, 0, 1, 1], [], []>} : vector<32x32xf32>, vector<32x8xf32>, vector<32x8xf32> -> vector<32x8xf32>
    %c0_8 = arith.constant 0 : index
    %c0_9 = arith.constant 0 : index
    %9 = vector.load %arg5[%c0_8, %c0_9] : memref<32x1xf32, #tpu.memory_space<vmem>>, vector<32x1xf32>
    %10 = vector.broadcast %9 : vector<32x1xf32> to vector<32x8xf32>
    %11 = arith.addf %8, %10 : vector<32x8xf32>
    %12 = math.tanh %11 : vector<32x8xf32>
    %c0_10 = arith.constant 0 : index
    %c0_11 = arith.constant 0 : index
    %13 = vector.load %arg6[%c0_10, %c0_11] : memref<32x1xf32, #tpu.memory_space<vmem>>, vector<32x1xf32>
    %14 = vector.broadcast %13 : vector<32x1xf32> to vector<32x8xf32>
    %15 = arith.mulf %12, %14 : vector<32x8xf32>
    %cst_12 = arith.constant dense<0.000000e+00> : vector<8xf32>
    %16 = vector.multi_reduction <add>, %15, %cst_12 [0] : vector<32x8xf32> to vector<8xf32>
    %17 = vector.shape_cast %16 : vector<8xf32> to vector<1x8xf32>
    %c0_13 = arith.constant 0 : index
    %c0_14 = arith.constant 0 : index
    %18 = memref.load %arg7[%c0_13, %c0_14] : memref<1x1xf32, #tpu.memory_space<smem>>
    %19 = vector.broadcast %18 : f32 to vector<1x8xf32>
    %20 = arith.addf %17, %19 : vector<1x8xf32>
    %c0_15 = arith.constant 0 : index
    %c0_16 = arith.constant 0 : index
    %21 = vector.load %arg8[%c0_15, %c0_16] : memref<1x8xf32, #tpu.memory_space<vmem>>, vector<1x8xf32>
    tpu.vector_store %arg8[%c0_15, %c0_16], %20 {strides = array<i32>} : memref<1x8xf32, #tpu.memory_space<vmem>>, vector<1x8xf32>,
    return
  }
  func.func @transform_0(%arg0: i32) -> (i32, i32) {
    %c0_i32 = arith.constant 0 : i32
    %c0_i32_0 = arith.constant 0 : i32
    return %arg0, %c0_i32 : i32, i32
  }
  func.func @transform_1(%arg0: i32) -> (i32, i32) {
    %c0_i32 = arith.constant 0 : i32
    %c0_i32_0 = arith.constant 0 : i32
    %c0_i32_1 = arith.constant 0 : i32
    return %c0_i32, %c0_i32_0 : i32, i32
  }
  func.func @transform_2(%arg0: i32) -> (i32, i32) {
    %c0_i32 = arith.constant 0 : i32
    %c0_i32_0 = arith.constant 0 : i32
    %c0_i32_1 = arith.constant 0 : i32
    return %c0_i32, %c0_i32_0 : i32, i32
  }
  func.func @transform_3(%arg0: i32) -> (i32, i32) {
    %c0_i32 = arith.constant 0 : i32
    %c0_i32_0 = arith.constant 0 : i32
    %c0_i32_1 = arith.constant 0 : i32
    return %c0_i32, %c0_i32_0 : i32, i32
  }
  func.func @transform_4(%arg0: i32) -> (i32, i32) {
    %c0_i32 = arith.constant 0 : i32
    %c0_i32_0 = arith.constant 0 : i32
    %c0_i32_1 = arith.constant 0 : i32
    return %c0_i32, %c0_i32_0 : i32, i32
  }
  func.func @transform_5(%arg0: i32) -> (i32, i32) {
    %c0_i32 = arith.constant 0 : i32
    %c0_i32_0 = arith.constant 0 : i32
    %c0_i32_1 = arith.constant 0 : i32
    return %c0_i32, %c0_i32_0 : i32, i32
  }
  func.func @transform_6(%arg0: i32) -> (i32, i32) {
    %c0_i32 = arith.constant 0 : i32
    %c0_i32_0 = arith.constant 0 : i32
    %c0_i32_1 = arith.constant 0 : i32
    return %c0_i32, %c0_i32_0 : i32, i32
  }
  func.func @transform_7(%arg0: i32) -> (i32, i32) {
    %c0_i32 = arith.constant 0 : i32
    %c0_i32_0 = arith.constant 0 : i32
    return %c0_i32, %arg0 : i32, i32
  }
}

</mosaic_0001>

<bundles_post_ra>
// kernel: tpu_custom_call.1
= control target key start
LH: loop header
LB: loop body
LE: loop exit
PB: predicated region body
PF: predicated region fallthrough
CT: control target
= control target key end

     0   :  { %vm57_vm0 = vcmask 130048   ;;  %v449_v4 = vmov 0   ;;  %s579_s0 = inlined_call_operand.vmem [shape: f32[8,16], index: 0, kind: input, shape index: {}]   ;;  %s580_s1 = inlined_call_operand.vmem [shape: f32[32,16], index: 1, kind: input, shape index: {}]   ;;  %s581_s2 = inlined_call_operand.vmem [shape: f32[32,1], index: 2, kind: input, shape index: {}]   ;;  %s582_s3 = inlined_call_operand.vmem [shape: f32[32,32], index: 3, kind: input, shape index: {}]   ;;  %s583_s4 = inlined_call_operand.vmem [shape: f32[32,1], index: 4, kind: input, shape index: {}]   ;;  %s584_s5 = inlined_call_operand.vmem [shape: f32[32,1], index: 5, kind: input, shape index: {}]   ;;  %s585_s6 = inlined_call_operand.<no memory space> [shape: f32[1,1], index: 6, kind: input, shape index: {}]   ;;  %s586_s7 = inlined_call_operand.hbm [shape: f32[1,8], index: 7, kind: output, shape index: {}]  }
   0x1   :  { %v28_v0 = vld [vmem:[%s579_s0] sm:$0xff]  ;;  %v30_v3 = vld [vmem:[%s580_s1 + $0x8] sm:$0xff]  ;;  %407 = vset.pattern.permute.xlu0 %v449_v4  ;;  %v35_v5 = vld [vmem:[%s581_s2 + $0x10] sm:$0xff]  ;;  %408 = vset.pattern.permute.xlu1 %v449_v4 }
   0x2   :  { %v29_v1 = vld [vmem:[%s580_s1] sm:$0xff]  ;;  %375 = vmatprep.subr.msk.mxu0 %vm57_vm0, %v28_v0  ;;  %v31_v6 = vld [vmem:[%s580_s1 + $0x10] sm:$0xff]  ;;  %49 = vperm.xlu1 %408, %v35_v5   ;;  %v34_v7 = vld [vmem:[%s581_s2 + $0x8] sm:$0xff] }
   0x3   :  { %377 = vmatprep.mubr.msk.f32.mxu0 %vm57_vm0, %v29_v1  ;;  %v33_v2 = vld [vmem:[%s581_s2] sm:$0xff]  ;;  %376 = vmatpush3.xpose.msk.msra.mxu0 %vm57_vm0, %v28_v0  ;;  %v36_v8 = vld [vmem:[%s581_s2 + $0x18] sm:$0xff] }
   0x4   :  { %39 = vperm.xlu0 %407, %v33_v2  }
   0x6   :  { %378 = vmatmul.mubr.msk.f32.vlgmr.msra.gmra.mrb[0].mxu0 %vm57_vm0, %v30_v3 }
   0x7   :  { %13 = vsyncpa [#allocation4], 0  ;;  %380 = vmatprep.mubr.msk.f32.mxu0 %vm57_vm0, %v31_v6  ;;  %v32_v9 = vld [vmem:[%s580_s1 + $0x18] sm:$0xff]  ;;  %54 = vperm.xlu1 %408, %v36_v8   ;;  %v166_v10 = vld [vmem:[%s583_s4] sm:$0xff]  ;;  %vm190_vm1 = vcmask 261120   ;;  %vm320_vm2 = vcmask 64512  }
   0x8   :  { %44 = vperm.xlu0 %407, %v34_v7   ;;  %v167_v11 = vld [vmem:[%s583_s4 + $0x8] sm:$0xff]  ;;  %v168_v12 = vld [vmem:[%s583_s4 + $0x10] sm:$0xff]  ;;  %v169_v13 = vld [vmem:[%s583_s4 + $0x18] sm:$0xff]  ;;  %s450_s15 = smov [#allocation3]   ;;  %vm337_vm3 = vcmask 57344  }
   0x9   :  { %v292_v14 = vld [vmem:[%s584_s5] sm:$0xff]  ;;  %v293_v15 = vld [vmem:[%s584_s5 + $0x8] sm:$0xff]  ;;  %v294_v16 = vld [vmem:[%s584_s5 + $0x10] sm:$0xff]  ;;  %s345_s16 = sshll.u32 %s450_s15, 4  ;;  %s346_s16 = int_to_ptr.vmem [resolvable:$true] %s345_s16 }
   0xa   :  { %381 = vmatmul.mubr.msk.f32.gmra.mrb[2].mxu0 %vm57_vm0, %v32_v9  ;;  %v295_v17 = vld [vmem:[%s584_s5 + $0x18] sm:$0xff]  ;;  %v162_v18 = vld [vmem:[%s582_s3] sm:$0xff]  ;;  %v163_v37 = vld [vmem:[%s582_s3 + $0x8] sm:$0xff]  ;;  %s425_s17 = scalar_lea.vmem %s346_s16, 16  ;;  %s429_s18 = scalar_lea.vmem %s346_s16, 32 }
   0xb   :  { %177 = vperm.xlu1 %408, %v167_v11   ;;  %391 = vmatprep.mubr.msk.f32.mxu1 %vm190_vm1, %v162_v18  ;;  %v164_v38 = vld [vmem:[%s582_s3 + $0x10] sm:$0xff]  ;;  %v165_v39 = vld [vmem:[%s582_s3 + $0x18] sm:$0xff]  ;;  %p426_p0 = scmp.ne.s32.totalorder %s346_s16, %s425_s17  ;;  %p430_p1 = scmp.lt.s32.totalorder %s346_s16, %s346_s16 }
   0xc   :  { %172 = vperm.xlu0 %407, %v166_v10   ;;  %p431_p2 = scmp.lt.s32.totalorder %s429_s18, %s425_s17 }
   0xe   :  { %p432_p3 = por %p431_p2, %p430_p1 }
   0xf   :  { %187 = vperm.xlu1 %408, %v169_v13  }
  0x10   :  { %182 = vperm.xlu0 %407, %v168_v12   ;;  %v335_v12 = vstv %s585_s6  ;;  %p433_p4 = pnand %p432_p3, %p426_p0 }
  0x13   :  { %303 = vperm.xlu1 %408, %v293_v15  }
  0x14   :  { %298 = vperm.xlu0 %407, %v292_v14  }
  0x17   :  { %313 = vperm.xlu1 %408, %v295_v17  }
  0x18   :  { %308 = vperm.xlu0 %407, %v294_v16  }
  0x81   :  { %v50_v20 = vpop.permute.xlu1 %49 }
  0x83   :  { %v40_v19 = vpop.permute.xlu0 %39 }
  0x86   :  { %v55_v26 = vpop.permute.xlu1 %54 }
  0x87   :  { %v45_v21 = vpop.permute.xlu0 %44 }
  0x8a   :  { %v178_v40 = vpop.permute.xlu1 %177 }
  0x8b   :  { %v173_v41 = vpop.permute.xlu0 %172 }
  0x8e   :  { %v188_v46 = vpop.permute.xlu1 %187 }
  0x8f   :  { %v183_v48 = vpop.permute.xlu0 %182 }
  0x92   :  { %v304_v53 = vpop.permute.xlu1 %303 }
  0x93   :  { %v299_v52 = vpop.permute.xlu0 %298 }
  0x96   :  { %v314_v63 = vpop.permute.xlu1 %313 }
  0x97   :  { %v309_v62 = vpop.permute.xlu0 %308 }
  0xd9   :  { %v379_v22 = vpop.f32.mrb[0].mxu0 }
  0xda   :  { %v145_v23 = vadd.f32 %v379_v22, %v45_v21  ;;  %v139_v24 = vpop.f32.mrb[1].mxu0 }
  0xdb   :  { %v140_v25 = vadd.f32 %v139_v24, %v40_v19 }
  0xdc   :  { %409 = vtanh.f32 %v145_v23 }
  0xdd   :  { %411 = vtanh.f32 %v140_v25  ;;  %v382_v27 = vpop.f32.mrb[2].mxu0 }
  0xde   :  { %v155_v28 = vadd.f32 %v382_v27, %v55_v26  ;;  %v149_v29 = vpop.f32.mrb[3].mxu0 }
  0xdf   :  { %v150_v30 = vadd.f32 %v149_v29, %v50_v20 }
  0xe0   :  { %413 = vtanh.f32 %v155_v28 }
  0xe1   :  { %415 = vtanh.f32 %v150_v30 }
  0xe6   :  { %v410_v31 = vpop.eup %409 }
  0xe7   :  { %v412_v32 = vpop.eup %411 }
  0xe8   :  { %v397_v33 = vpack.c.bf16 %v410_v31, %v412_v32 }
  0xea   :  { %v414_v34 = vpop.eup %413  ;;  %398 = vmatprep.subr.bf16.mxu1 %v397_v33 }
  0xeb   :  { %v416_v35 = vpop.eup %415  ;;  %400 = vmatpush3.bf16.msra.mxu1 %v397_v33 }
  0xec   :  { %v401_v36 = vpack.c.bf16 %v414_v34, %v416_v35 }
  0xee   :  { %402 = vmatprep.subr.bf16.mxu1 %v401_v36 }
  0xef   :  { %404 = vmatpush3.bf16.msra.mxu1 %v401_v36 }
  0xf2   :  { %392 = vmatmul.mubr.msk.f32.vlgmr.msra.gmra.mrb[0].mxu1 %vm190_vm1, %v163_v37 }
  0xf3   :  { %394 = vmatprep.mubr.msk.f32.mxu1 %vm190_vm1, %v164_v38 }
  0xf6   :  { %395 = vmatmul.mubr.msk.f32.gmra.mrb[2].mxu1 %vm190_vm1, %v165_v39 }
 0x1c5   :  { %v393_v42 = vpop.f32.mrb[0].mxu1 }
 0x1c6   :  { %v275_v43 = vadd.f32 %v393_v42, %v178_v40  ;;  %v269_v44 = vpop.f32.mrb[1].mxu1 }
 0x1c7   :  { %v270_v45 = vadd.f32 %v269_v44, %v173_v41 }
 0x1c8   :  { %417 = vtanh.f32 %v275_v43 }
 0x1c9   :  { %419 = vtanh.f32 %v270_v45  ;;  %v396_v47 = vpop.f32.mrb[2].mxu1 }
 0x1ca   :  { %v285_v49 = vadd.f32 %v396_v47, %v188_v46  ;;  %v279_v50 = vpop.f32.mrb[3].mxu1 }
 0x1cb   :  { %v280_v51 = vadd.f32 %v279_v50, %v183_v48 }
 0x1cc   :  { %421 = vtanh.f32 %v285_v49 }
 0x1cd   :  { %423 = vtanh.f32 %v280_v51 }
 0x1d2   :  { %v418_v54 = vpop.eup %417 }
 0x1d3   :  { %v420_v55 = vpop.eup %419  ;;  %v317_v56 = vmul.f32 %v418_v54, %v304_v53 }
 0x1d4   :  { %v316_v57 = vmul.f32 %v420_v55, %v299_v52 }
 0x1d5   :  { %v322_v58 = vsel %vm320_vm2, %v317_v56, 0.0 }
 0x1d6   :  { %v422_v59 = vpop.eup %421  ;;  %v321_v60 = vsel %vm320_vm2, %v316_v57, 0.0 }
 0x1d7   :  { %v424_v61 = vpop.eup %423  ;;  %v323_v0 = vadd.f32 %v322_v58, %v321_v60  ;;  %v319_v1 = vmul.f32 %v422_v59, %v314_v63 }
 0x1d8   :  { %v318_v2 = vmul.f32 %v424_v61, %v309_v62 }
 0x1d9   :  { %v326_v5 = vsel %vm320_vm2, %v319_v1, 0.0 }
 0x1da   :  { %v324_v3 = vsel %vm320_vm2, %v318_v2, 0.0 }
 0x1db   :  { %v325_v4 = vadd.f32 %v324_v3, %v323_v0 }
 0x1dd   :  { %v327_v6 = vadd.f32 %v326_v5, %v325_v4 }
 0x1df   :  { %v328_v7 = vrot.slane %v327_v6, 4 }
 0x1e1   :  { %v329_v8 = vadd.f32 %v328_v7, %v327_v6 }
 0x1e3   :  { %v330_v9 = vrot.slane %v329_v8, 2 }
 0x1e5   :  { %v331_v10 = vadd.f32 %v330_v9, %v329_v8 }
 0x1e7   :  { %v332_v11 = vrot.slane %v331_v10, 1 }
 0x1e9   :  { %v333_v13 = vadd.f32 %v332_v11, %v331_v10 }
 0x1eb   :  { %v336_v14 = vadd.f32 %v335_v12, %v333_v13 }
 0x1ed   :  { %338 = vst.msk [vmem:[#allocation3] sm:$0x1] %vm337_vm3, %v336_v14 }
 0x1ee   :  { %436 = shalt.err (!%p433_p4)
}
 0x1ef   :  { %s437_s21 = scalar_lea.hbm %s586_s7, 16 }
 0x1f0   :  { %p438_p5 = scmp.ne.s32.totalorder %s586_s7, %s437_s21  ;;  %p441_p6 = scmp.lt.u32.totalorder %s437_s21, %s586_s7 }
 0x1f2   :  { %p443_p7 = pnand %p441_p6, %p438_p5 }
 0x1f4   :  { %446 = shalt.err (!%p443_p7)
}
 0x1f5   :  { %348 = dma.vmem_to_hbm [thread:$0]  %s346_s16, 16, %s586_s7, [#allocation4]  }
 0x1f6   :  { %447 = dma.done.wait [#allocation4], 16  }
 0x1f7   :  { %448 = vsyncadd [#allocation4], 4294967280 }
 0x1f8   :  { %352 = vsyncpa [#allocation4], 1 }

</bundles_post_ra>
